<compile_context>
chip_gen: v5e
topology: v5e:2x2
jax: 0.10.0
libtpu: 0.0.40
codegen_flags: <defaults>
</compile_context>

<pallas_src>
import functools

import numpy as np

import jax
import jax.numpy as jnp
from jax.experimental import pallas as pl
from jax.experimental.pallas import tpu as pltpu


def _round_up(x, m):
    return ((x + m - 1) // m) * m


def _pick_tile_b(batch):
    for t in (256, 128, 64, 32, 16, 8):
        if batch % t == 0:
            return t
    return batch  # block == full array dim along sublanes, always legal


# ----------------------------------------------------------------------------
# Pallas kernel: fully fused ANN forward
# ----------------------------------------------------------------------------
def _ann_kernel(emb_offsets, emb_sizes, n_hidden,
                num_ref, cat_ref, emb_mat_ref, w1n_ref, shift1_ref, *refs):
    """refs = [W_k, shift_k] * (n_hidden-1) + [W_out, b_out] + [out_ref]."""
    out_ref = refs[-1]
    w_out_ref, b_out_ref = refs[-3], refs[-2]
    hidden_refs = refs[:-3]

    tile_b = num_ref.shape[0]
    total_rows = emb_mat_ref.shape[0]

    # --- CategoryEmbedding lookups fused as one-hot @ (table @ W1_emb) ------
    cat = cat_ref[...]                                           # (TILE_B, n_cat) i32
    col = jax.lax.broadcasted_iota(jnp.int32, (tile_b, total_rows), 1)
    onehot = jnp.zeros((tile_b, total_rows), jnp.float32)
    for i, (off, n_emb) in enumerate(zip(emb_offsets, emb_sizes)):
        idx = cat[:, i:i + 1]                                    # (TILE_B, 1)
        # Faithful to CategoryEmbedding.forward's two where-clamps:
        idx = jnp.where(idx < n_emb, idx, n_emb - 1)
        idx = jnp.where(idx < 0, idx, 0)
        idx = jnp.clip(idx, 0, n_emb - 1)                        # OOB -> clip
        onehot = onehot + (col == idx + off).astype(jnp.float32)

    # --- first FFUnit (Linear + BN folded; embedding tables folded in) ------
    z = jnp.dot(num_ref[...], w1n_ref[...], preferred_element_type=jnp.float32)
    z = z + jnp.dot(onehot, emb_mat_ref[...], preferred_element_type=jnp.float32)
    h = jnp.maximum(z + shift1_ref[...], 0.0)                    # ReLU; Dropout=id

    # --- remaining FFUnits ---------------------------------------------------
    for k in range(n_hidden - 1):
        w_ref = hidden_refs[2 * k]
        s_ref = hidden_refs[2 * k + 1]
        z = jnp.dot(h, w_ref[...], preferred_element_type=jnp.float32) + s_ref[...]
        h = jnp.maximum(z, 0.0)

    # --- output Linear (lane-dense: padded to a multiple of 128 columns) ----
    out_ref[...] = (
        jnp.dot(h, w_out_ref[...], preferred_element_type=jnp.float32) + b_out_ref[...]
    )


# ----------------------------------------------------------------------------
# Parameter folding / padding (constant folds on constants, done once)
# ----------------------------------------------------------------------------
def prepare_kernel_params(emb_tables, hidden_raw, out_raw, numerical_features,
                          eps=1e-5, pad=128):
    # Fold BatchNorm1d(eval) + bias into the Linear weights.
    folded = []
    for (w, b, gamma, beta, mean, var) in hidden_raw:
        s = gamma / jnp.sqrt(var + eps)
        folded.append((w * s[None, :], b * s + (beta - mean * s)))

    hidden_units = [w.shape[1] for w, _ in folded]
    h_pads = [_round_up(h, pad) for h in hidden_units]

    w1, shift1 = folded[0]
    w1_num = w1[:numerical_features]          # rows for numerical features
    w1_emb = w1[numerical_features:]          # rows for concatenated embeddings

    # Fold each embedding table into the first layer: M_i = table_i @ W1_emb_i.
    blocks, offsets, sizes, doff = [], [], [], 0
    for t in emb_tables:
        n_emb, d_emb = t.shape
        offsets.append(sum(sizes))
        sizes.append(n_emb)
        blocks.append(t @ w1_emb[doff:doff + d_emb])
        doff += d_emb
    emb_mat = jnp.concatenate(blocks, axis=0)

    def pad2(a, rows, cols):
        return jnp.pad(a, ((0, rows - a.shape[0]), (0, cols - a.shape[1])))

    w1_num_p = pad2(w1_num, w1_num.shape[0], h_pads[0])
    emb_mat_p = pad2(emb_mat, emb_mat.shape[0], h_pads[0])
    shift1_p = pad2(shift1[None, :], 1, h_pads[0])

    rest_hidden = []
    for k in range(1, len(folded)):
        w, sh = folded[k]
        rest_hidden.append((pad2(w, h_pads[k - 1], h_pads[k]),
                            pad2(sh[None, :], 1, h_pads[k])))

    w_out, b_out = out_raw
    c = w_out.shape[1]
    c_pad = _round_up(c, pad)
    w_out_p = pad2(w_out, h_pads[-1], c_pad)
    b_out_p = pad2(b_out[None, :], 1, c_pad)

    return dict(emb_offsets=tuple(offsets), emb_sizes=tuple(sizes),
                w1_num=w1_num_p, emb_mat=emb_mat_p, shift1=shift1_p,
                rest_hidden=rest_hidden, w_out=w_out_p, b_out=b_out_p,
                num_classes=c)


# ----------------------------------------------------------------------------
# Wrapper: one fused pallas_call
# ----------------------------------------------------------------------------
def ann_forward_pallas(numerical, categorical, kp):
    B, f_num = numerical.shape
    c_pad = kp["w_out"].shape[1]
    tile_b = _pick_tile_b(B)
    n_hidden = 1 + len(kp["rest_hidden"])

    flat = [numerical.astype(jnp.float32), categorical.astype(jnp.int32),
            kp["emb_mat"], kp["w1_num"], kp["shift1"]]
    for (w, s) in kp["rest_hidden"]:
        flat += [w, s]
    flat += [kp["w_out"], kp["b_out"]]

    # Batch-tiled specs for the per-example inputs / output; constant index_maps
    # keep all weights resident in VMEM across grid steps.
    in_specs = [pl.BlockSpec((tile_b, f_num), lambda i: (i, 0)),
                pl.BlockSpec((tile_b, categorical.shape[1]), lambda i: (i, 0))]
    in_specs += [pl.BlockSpec(a.shape, lambda i: (0, 0)) for a in flat[2:]]

    # Advisory cost estimate (helps XLA schedule around the custom call).
    flops = 2 * B * (f_num * kp["w1_num"].shape[1]
                     + kp["emb_mat"].shape[0] * kp["emb_mat"].shape[1])
    for (w, _) in kp["rest_hidden"]:
        flops += 2 * B * w.shape[0] * w.shape[1]
    flops += 2 * B * kp["w_out"].shape[0] * kp["w_out"].shape[1]
    bytes_accessed = 4 * (numerical.size + categorical.size + B * c_pad
                          + sum(int(np.prod(a.shape)) for a in flat[2:]))

    kernel = functools.partial(_ann_kernel, kp["emb_offsets"], kp["emb_sizes"],
                               n_hidden)

    out = pl.pallas_call(
        kernel,
        out_shape=jax.ShapeDtypeStruct((B, c_pad), jnp.float32),
        grid=(pl.cdiv(B, tile_b),),
        in_specs=in_specs,
        out_specs=pl.BlockSpec((tile_b, c_pad), lambda i: (i, 0)),
        compiler_params=pltpu.CompilerParams(dimension_semantics=("parallel",)),
        cost_estimate=pl.CostEstimate(flops=flops, transcendentals=0,
                                      bytes_accessed=bytes_accessed),
    )(*flat)

    return out[:, :kp["num_classes"]]   # strip lane padding -> real logits


# ----------------------------------------------------------------------------
# Pure-JAX reference (mirrors the PyTorch forward) for a correctness check
# ----------------------------------------------------------------------------
def ann_forward_reference(numerical, categorical, emb_tables, hidden_raw,
                          out_raw, eps=1e-5):
    embs = []
    for i, table in enumerate(emb_tables):
        n_emb = table.shape[0]
        x = categorical[:, i]
        x = jnp.where(x < n_emb, x, n_emb - 1)
        x = jnp.where(x < 0, x, 0)          # faithful to the reference module
        x = jnp.clip(x, 0, n_emb - 1)
        embs.append(jnp.take(table, x, axis=0))
    h = jnp.concatenate([numerical] + embs, axis=1)
    for (w, b, gamma, beta, mean, var) in hidden_raw:
        z = h @ w + b
        z = (z - mean) / jnp.sqrt(var + eps) * gamma + beta
        h = jnp.maximum(z, 0.0)
    w_out, b_out = out_raw
    return h @ w_out + b_out


# ----------------------------------------------------------------------------
# Deterministic parameter construction (matches the __init__ shapes)
# ----------------------------------------------------------------------------
def build_params(key, numerical_features, categorical_max_values, hidden_units,
                 output_classes):
    keys = iter(jax.random.split(key, 64))

    emb_tables, cat_dim = [], 0
    for max_val in categorical_max_values:
        n_emb = max_val + 1
        d_emb = n_emb // 2
        std = (2.0 / max(d_emb, 1)) ** 0.5      # kaiming_normal_, fan_out, relu
        emb_tables.append(std * jax.random.normal(next(keys), (n_emb, d_emb),
                                                  dtype=jnp.float32))
        cat_dim += d_emb

    in_dim = numerical_features + cat_dim
    hidden_raw, prev = [], in_dim
    for h in hidden_units:
        std = (2.0 / prev) ** 0.5               # kaiming_normal_, fan_in, relu
        w = std * jax.random.normal(next(keys), (prev, h), dtype=jnp.float32)
        b = 0.01 * jax.random.normal(next(keys), (h,), dtype=jnp.float32)
        # BatchNorm1d eval with default buffers: gamma=1, beta=0, mean=0, var=1
        # (fold uses real running stats when loading trained weights)
        hidden_raw.append((w, b,
                           jnp.ones((h,), jnp.float32), jnp.zeros((h,), jnp.float32),
                           jnp.zeros((h,), jnp.float32), jnp.ones((h,), jnp.float32)))
        prev = h

    std = (2.0 / prev) ** 0.5
    w_out = std * jax.random.normal(next(keys), (prev, output_classes),
                                    dtype=jnp.float32)
    b_out = 0.01 * jax.random.normal(next(keys), (output_classes,),
                                     dtype=jnp.float32)
    return emb_tables, hidden_raw, (w_out, b_out)


# ----------------------------------------------------------------------------
if __name__ == "__main__":
    key = jax.random.PRNGKey(0)
    k_param, k_num, k_cat = jax.random.split(key, 3)

    # Small, shape-consistent example configuration.
    batch = 8
    numerical_features = 8
    categorical_max_values = [5, 9]       # -> embedding dims 3 and 5
    hidden_units = [32, 16]
    output_classes = 4

    emb_tables, hidden_raw, out_raw = build_params(
        k_param, numerical_features, categorical_max_values, hidden_units,
        output_classes)
    kernel_params = prepare_kernel_params(
        emb_tables, hidden_raw, out_raw, numerical_features)

    numerical = jax.random.normal(k_num, (batch, numerical_features),
                                  dtype=jnp.float32)
    categorical = jax.random.randint(
        k_cat, (batch, len(categorical_max_values)), 0,
        max(categorical_max_values) + 1, dtype=jnp.int32)

    logits = ann_forward_pallas(numerical, categorical, kernel_params)
    logits = jax.block_until_ready(logits)

    assert logits.shape == (batch, output_classes)
    assert logits.dtype == jnp.float32

    ref = ann_forward_reference(numerical, categorical, emb_tables, hidden_raw,
                                out_raw)
    np.testing.assert_allclose(np.asarray(logits), np.asarray(ref),
                               rtol=5e-2, atol=5e-2)

    # TODO(synk): Dropout (train-mode) and Softmax (.predict) are outside the
    # eval forward pass and are not implemented in the kernel.
    print("KERNEL_OK")
</pallas_src>

<mosaic_0001>
module attributes {stable_mosaic.version = 11 : i64} {
  func.func @_ann_kernel(%arg0: i32, %arg1: memref<8x8xf32, #tpu.memory_space<vmem>>, %arg2: memref<8x2xi32, #tpu.memory_space<vmem>>, %arg3: memref<16x128xf32, #tpu.memory_space<vmem>>, %arg4: memref<8x128xf32, #tpu.memory_space<vmem>>, %arg5: memref<1x128xf32, #tpu.memory_space<vmem>>, %arg6: memref<128x128xf32, #tpu.memory_space<vmem>>, %arg7: memref<1x128xf32, #tpu.memory_space<vmem>>, %arg8: memref<128x128xf32, #tpu.memory_space<vmem>>, %arg9: memref<1x128xf32, #tpu.memory_space<vmem>>, %arg10: memref<8x128xf32, #tpu.memory_space<vmem>>) attributes {dimension_semantics = [#tpu.dimension_semantics<parallel>], iteration_bounds = array<i64: 1>, scalar_prefetch = 0 : i64, scratch_operands = 0 : i64, tpu.core_type = #tpu.core_type<tc>, window_params = [{transform_indices = @transform_0, window_bounds = array<i64: 8, 8>}, {transform_indices = @transform_1, window_bounds = array<i64: 8, 2>}, {pipeline_mode = #tpu.pipeline_mode<synchronous>, transform_indices = @transform_2, window_bounds = array<i64: 16, 128>}, {pipeline_mode = #tpu.pipeline_mode<synchronous>, transform_indices = @transform_3, window_bounds = array<i64: 8, 128>}, {pipeline_mode = #tpu.pipeline_mode<synchronous>, transform_indices = @transform_4, window_bounds = array<i64: 1, 128>}, {pipeline_mode = #tpu.pipeline_mode<synchronous>, transform_indices = @transform_5, window_bounds = array<i64: 128, 128>}, {pipeline_mode = #tpu.pipeline_mode<synchronous>, transform_indices = @transform_6, window_bounds = array<i64: 1, 128>}, {pipeline_mode = #tpu.pipeline_mode<synchronous>, transform_indices = @transform_7, window_bounds = array<i64: 128, 128>}, {pipeline_mode = #tpu.pipeline_mode<synchronous>, transform_indices = @transform_8, window_bounds = array<i64: 1, 128>}, {transform_indices = @transform_9, window_bounds = array<i64: 8, 128>}]} {
    %c0 = arith.constant 0 : index
    %c0_0 = arith.constant 0 : index
    %0 = vector.load %arg2[%c0, %c0_0] : memref<8x2xi32, #tpu.memory_space<vmem>>, vector<8x2xi32>
    %1 = tpu.iota {dimensions = array<i32: 1>} : vector<8x16xi32>
    %cst = arith.constant 0.000000e+00 : f32
    %2 = vector.broadcast %cst : f32 to vector<8x16xf32>
    %3 = vector.extract_strided_slice %0 {offsets = [0, 0], sizes = [8, 1], strides = [1, 1]} : vector<8x2xi32> to vector<8x1xi32>
    %c6_i32 = arith.constant 6 : i32
    %4 = vector.broadcast %c6_i32 : i32 to vector<8x1xi32>
    %5 = arith.cmpi slt, %3, %4 : vector<8x1xi32>
    %c5_i32 = arith.constant 5 : i32
    %6 = vector.broadcast %c5_i32 : i32 to vector<8x1xi32>
    %7 = arith.select %5, %3, %6 : vector<8x1xi1>, vector<8x1xi32>
    %c0_i32 = arith.constant 0 : i32
    %8 = vector.broadcast %c0_i32 : i32 to vector<8x1xi32>
    %9 = arith.cmpi slt, %7, %8 : vector<8x1xi32>
    %c0_i32_1 = arith.constant 0 : i32
    %10 = vector.broadcast %c0_i32_1 : i32 to vector<8x1xi32>
    %11 = arith.select %9, %7, %10 : vector<8x1xi1>, vector<8x1xi32>
    %c0_i32_2 = arith.constant 0 : i32
    %c5_i32_3 = arith.constant 5 : i32
    %12 = vector.broadcast %c0_i32_2 : i32 to vector<8x1xi32>
    %13 = arith.maxsi %12, %11 : vector<8x1xi32>
    %14 = vector.broadcast %c5_i32_3 : i32 to vector<8x1xi32>
    %15 = arith.minsi %14, %13 : vector<8x1xi32>
    %c0_i32_4 = arith.constant 0 : i32
    %16 = vector.broadcast %c0_i32_4 : i32 to vector<8x1xi32>
    %17 = arith.addi %15, %16 : vector<8x1xi32>
    %18 = vector.broadcast %17 : vector<8x1xi32> to vector<8x16xi32>
    %19 = arith.cmpi eq, %1, %18 : vector<8x16xi32>
    %20 = arith.extui %19 : vector<8x16xi1> to vector<8x16xi32>
    %21 = arith.sitofp %20 : vector<8x16xi32> to vector<8x16xf32>
    %22 = arith.addf %2, %21 : vector<8x16xf32>
    %23 = vector.extract_strided_slice %0 {offsets = [0, 1], sizes = [8, 1], strides = [1, 1]} : vector<8x2xi32> to vector<8x1xi32>
    %c10_i32 = arith.constant 10 : i32
    %24 = vector.broadcast %c10_i32 : i32 to vector<8x1xi32>
    %25 = arith.cmpi slt, %23, %24 : vector<8x1xi32>
    %c9_i32 = arith.constant 9 : i32
    %26 = vector.broadcast %c9_i32 : i32 to vector<8x1xi32>
    %27 = arith.select %25, %23, %26 : vector<8x1xi1>, vector<8x1xi32>
    %c0_i32_5 = arith.constant 0 : i32
    %28 = vector.broadcast %c0_i32_5 : i32 to vector<8x1xi32>
    %29 = arith.cmpi slt, %27, %28 : vector<8x1xi32>
    %c0_i32_6 = arith.constant 0 : i32
    %30 = vector.broadcast %c0_i32_6 : i32 to vector<8x1xi32>
    %31 = arith.select %29, %27, %30 : vector<8x1xi1>, vector<8x1xi32>
    %c0_i32_7 = arith.constant 0 : i32
    %c9_i32_8 = arith.constant 9 : i32
    %32 = vector.broadcast %c0_i32_7 : i32 to vector<8x1xi32>
    %33 = arith.maxsi %32, %31 : vector<8x1xi32>
    %34 = vector.broadcast %c9_i32_8 : i32 to vector<8x1xi32>
    %35 = arith.minsi %34, %33 : vector<8x1xi32>
    %c6_i32_9 = arith.constant 6 : i32
    %36 = vector.broadcast %c6_i32_9 : i32 to vector<8x1xi32>
    %37 = arith.addi %35, %36 : vector<8x1xi32>
    %38 = vector.broadcast %37 : vector<8x1xi32> to vector<8x16xi32>
    %39 = arith.cmpi eq, %1, %38 : vector<8x16xi32>
    %40 = arith.extui %39 : vector<8x16xi1> to vector<8x16xi32>
    %41 = arith.sitofp %40 : vector<8x16xi32> to vector<8x16xf32>
    %42 = arith.addf %22, %41 : vector<8x16xf32>
    %c0_10 = arith.constant 0 : index
    %c0_11 = arith.constant 0 : index
    %43 = vector.load %arg1[%c0_10, %c0_11] : memref<8x8xf32, #tpu.memory_space<vmem>>, vector<8x8xf32>
    %c0_12 = arith.constant 0 : index
    %c0_13 = arith.constant 0 : index
    %44 = vector.load %arg4[%c0_12, %c0_13] : memref<8x128xf32, #tpu.memory_space<vmem>>, vector<8x128xf32>
    %cst_14 = arith.constant dense<0.000000e+00> : vector<8x128xf32>
    %45 = tpu.matmul %43, %44, %cst_14 {dimension_numbers = #tpu.dot_dimension_numbers<[1], [0], [0], [1], [0, 0, 1, 1], [], []>} : vector<8x8xf32>, vector<8x128xf32>, vector<8x128xf32> -> vector<8x128xf32>
    %c0_15 = arith.constant 0 : index
    %c0_16 = arith.constant 0 : index
    %46 = vector.load %arg3[%c0_15, %c0_16] : memref<16x128xf32, #tpu.memory_space<vmem>>, vector<16x128xf32>
    %cst_17 = arith.constant dense<0.000000e+00> : vector<8x128xf32>
    %47 = tpu.matmul %42, %46, %cst_17 {dimension_numbers = #tpu.dot_dimension_numbers<[1], [0], [0], [1], [0, 0, 1, 1], [], []>} : vector<8x16xf32>, vector<16x128xf32>, vector<8x128xf32> -> vector<8x128xf32>
    %48 = arith.addf %45, %47 : vector<8x128xf32>
    %c0_18 = arith.constant 0 : index
    %c0_19 = arith.constant 0 : index
    %49 = vector.load %arg5[%c0_18, %c0_19] : memref<1x128xf32, #tpu.memory_space<vmem>>, vector<1x128xf32>
    %50 = vector.broadcast %49 : vector<1x128xf32> to vector<8x128xf32>
    %51 = arith.addf %48, %50 : vector<8x128xf32>
    %cst_20 = arith.constant 0.000000e+00 : f32
    %52 = vector.broadcast %cst_20 : f32 to vector<8x128xf32>
    %53 = arith.maximumf %51, %52 : vector<8x128xf32>
    %c0_21 = arith.constant 0 : index
    %c0_22 = arith.constant 0 : index
    %54 = vector.load %arg6[%c0_21, %c0_22] : memref<128x128xf32, #tpu.memory_space<vmem>>, vector<128x128xf32>
    %cst_23 = arith.constant dense<0.000000e+00> : vector<8x128xf32>
    %55 = tpu.matmul %53, %54, %cst_23 {dimension_numbers = #tpu.dot_dimension_numbers<[1], [0], [0], [1], [0, 0, 1, 1], [], []>} : vector<8x128xf32>, vector<128x128xf32>, vector<8x128xf32> -> vector<8x128xf32>
    %c0_24 = arith.constant 0 : index
    %c0_25 = arith.constant 0 : index
    %56 = vector.load %arg7[%c0_24, %c0_25] : memref<1x128xf32, #tpu.memory_space<vmem>>, vector<1x128xf32>
    %57 = vector.broadcast %56 : vector<1x128xf32> to vector<8x128xf32>
    %58 = arith.addf %55, %57 : vector<8x128xf32>
    %cst_26 = arith.constant 0.000000e+00 : f32
    %59 = vector.broadcast %cst_26 : f32 to vector<8x128xf32>
    %60 = arith.maximumf %58, %59 : vector<8x128xf32>
    %c0_27 = arith.constant 0 : index
    %c0_28 = arith.constant 0 : index
    %61 = vector.load %arg8[%c0_27, %c0_28] : memref<128x128xf32, #tpu.memory_space<vmem>>, vector<128x128xf32>
    %cst_29 = arith.constant dense<0.000000e+00> : vector<8x128xf32>
    %62 = tpu.matmul %60, %61, %cst_29 {dimension_numbers = #tpu.dot_dimension_numbers<[1], [0], [0], [1], [0, 0, 1, 1], [], []>} : vector<8x128xf32>, vector<128x128xf32>, vector<8x128xf32> -> vector<8x128xf32>
    %c0_30 = arith.constant 0 : index
    %c0_31 = arith.constant 0 : index
    %63 = vector.load %arg9[%c0_30, %c0_31] : memref<1x128xf32, #tpu.memory_space<vmem>>, vector<1x128xf32>
    %64 = vector.broadcast %63 : vector<1x128xf32> to vector<8x128xf32>
    %65 = arith.addf %62, %64 : vector<8x128xf32>
    %c0_32 = arith.constant 0 : index
    %c0_33 = arith.constant 0 : index
    %66 = vector.load %arg10[%c0_32, %c0_33] : memref<8x128xf32, #tpu.memory_space<vmem>>, vector<8x128xf32>
    tpu.vector_store %arg10[%c0_32, %c0_33], %65 {strides = array<i32>} : memref<8x128xf32, #tpu.memory_space<vmem>>, vector<8x128xf32>,
    return
  }
  func.func @transform_0(%arg0: i32) -> (i32, i32) {
    %c0_i32 = arith.constant 0 : i32
    %c0_i32_0 = arith.constant 0 : i32
    return %arg0, %c0_i32 : i32, i32
  }
  func.func @transform_1(%arg0: i32) -> (i32, i32) {
    %c0_i32 = arith.constant 0 : i32
    %c0_i32_0 = arith.constant 0 : i32
    return %arg0, %c0_i32 : i32, i32
  }
  func.func @transform_2(%arg0: i32) -> (i32, i32) {
    %c0_i32 = arith.constant 0 : i32
    %c0_i32_0 = arith.constant 0 : i32
    %c0_i32_1 = arith.constant 0 : i32
    return %c0_i32, %c0_i32_0 : i32, i32
  }
  func.func @transform_3(%arg0: i32) -> (i32, i32) {
    %c0_i32 = arith.constant 0 : i32
    %c0_i32_0 = arith.constant 0 : i32
    %c0_i32_1 = arith.constant 0 : i32
    return %c0_i32, %c0_i32_0 : i32, i32
  }
  func.func @transform_4(%arg0: i32) -> (i32, i32) {
    %c0_i32 = arith.constant 0 : i32
    %c0_i32_0 = arith.constant 0 : i32
    %c0_i32_1 = arith.constant 0 : i32
    return %c0_i32, %c0_i32_0 : i32, i32
  }
  func.func @transform_5(%arg0: i32) -> (i32, i32) {
    %c0_i32 = arith.constant 0 : i32
    %c0_i32_0 = arith.constant 0 : i32
    %c0_i32_1 = arith.constant 0 : i32
    return %c0_i32, %c0_i32_0 : i32, i32
  }
  func.func @transform_6(%arg0: i32) -> (i32, i32) {
    %c0_i32 = arith.constant 0 : i32
    %c0_i32_0 = arith.constant 0 : i32
    %c0_i32_1 = arith.constant 0 : i32
    return %c0_i32, %c0_i32_0 : i32, i32
  }
  func.func @transform_7(%arg0: i32) -> (i32, i32) {
    %c0_i32 = arith.constant 0 : i32
    %c0_i32_0 = arith.constant 0 : i32
    %c0_i32_1 = arith.constant 0 : i32
    return %c0_i32, %c0_i32_0 : i32, i32
  }
  func.func @transform_8(%arg0: i32) -> (i32, i32) {
    %c0_i32 = arith.constant 0 : i32
    %c0_i32_0 = arith.constant 0 : i32
    %c0_i32_1 = arith.constant 0 : i32
    return %c0_i32, %c0_i32_0 : i32, i32
  }
  func.func @transform_9(%arg0: i32) -> (i32, i32) {
    %c0_i32 = arith.constant 0 : i32
    %c0_i32_0 = arith.constant 0 : i32
    return %arg0, %c0_i32 : i32, i32
  }
}

</mosaic_0001>

<bundles_post_ra>
// kernel: tpu_custom_call.1
= control target key start
LH: loop header
LB: loop body
LE: loop exit
PB: predicated region body
PF: predicated region fallthrough
CT: control target
= control target key end

     0   :  { %14 = vsyncpa [#allocation3], 0  ;;  %s524_s0 = inlined_call_operand.vmem [shape: f32[8,8], index: 0, kind: input, shape index: {}]   ;;  %s525_s1 = inlined_call_operand.vmem [shape: s32[8,2], index: 1, kind: input, shape index: {}]   ;;  %s526_s2 = inlined_call_operand.hbm [shape: f32[16,128], index: 2, kind: input, shape index: {}]   ;;  %s527_s3 = inlined_call_operand.hbm [shape: f32[8,128], index: 3, kind: input, shape index: {}]   ;;  %s528_s4 = inlined_call_operand.vmem [shape: f32[1,128], index: 4, kind: input, shape index: {}]   ;;  %s529_s5 = inlined_call_operand.hbm [shape: f32[128,128], index: 5, kind: input, shape index: {}]   ;;  %s530_s6 = inlined_call_operand.vmem [shape: f32[1,128], index: 6, kind: input, shape index: {}]   ;;  %s531_s7 = inlined_call_operand.hbm [shape: f32[128,128], index: 7, kind: input, shape index: {}]   ;;  %s532_s8 = inlined_call_operand.vmem [shape: f32[1,128], index: 8, kind: input, shape index: {}]   ;;  %s533_s9 = inlined_call_operand.hbm [shape: f32[8,128], index: 9, kind: output, shape index: {}]  }
   0x1   :  { %15 = vsyncpa [#allocation6], 0 }
   0x2   :  { %16 = vsyncpa [#allocation9], 0  ;;  %s40_s11 = sshll.u32 %s527_s3, 4  ;;  %s41_s11 = int_to_ptr.hbm [resolvable:$true] %s40_s11 }
   0x3   :  { %17 = vsyncpa [#allocation4], 0  ;;  %s434_s12 = smov [#allocation5]   ;;  %s26_s16 = sshll.u32 %s526_s2, 4  ;;  %s27_s16 = int_to_ptr.hbm [resolvable:$true] %s26_s16 }
   0x4   :  { %s42_s13 = sshll.u32 %s434_s12, 4  ;;  %s435_s17 = smov [#allocation2]   ;;  %s43_s13 = int_to_ptr.vmem [resolvable:$true] %s42_s13 }
   0x5   :  { %45 = dma.hbm_to_vmem [thread:$0]  %s41_s11, 128, %s43_s13, [#allocation6]  }
   0x6   :  { %s28_s18 = sshll.u32 %s435_s17, 4  ;;  %s436_s19 = smov 128   ;;  %s29_s18 = int_to_ptr.vmem [resolvable:$true] %s28_s18 }
   0x7   :  { %s437_s20 = smov 8   ;;  %s52_s3 = sshll.u32 %s529_s5, 4  ;;  %s53_s3 = int_to_ptr.hbm [resolvable:$true] %s52_s3 }
   0x8   :  { %34 = dma.hbm_to_vmem [thread:$0]  %s27_s16, 256, %s29_s18, [#allocation3], %s436_s19, %s436_s19, %s437_s20  }
   0x9   :  { %s438_s23 = smov [#allocation7]   ;;  %s67_s2 = sshll.u32 %s531_s7, 4  ;;  %s68_s2 = int_to_ptr.hbm [resolvable:$true] %s67_s2 }
   0xa   :  { %s54_s24 = sshll.u32 %s438_s23, 4  ;;  %s439_s27 = smov [#allocation8]   ;;  %s55_s24 = int_to_ptr.vmem [resolvable:$true] %s54_s24 }
   0xb   :  { %60 = dma.hbm_to_vmem [thread:$0]  %s53_s3, 2048, %s55_s24, [#allocation6], %s436_s19, %s436_s19, %s437_s20  }
   0xc   :  { %s69_s28 = sshll.u32 %s439_s27, 4  ;;  %s70_s28 = int_to_ptr.vmem [resolvable:$true] %s69_s28 }
   0xd   :  { %75 = dma.hbm_to_vmem [thread:$0]  %s68_s2, 2048, %s70_s28, [#allocation9], %s436_s19, %s436_s19, %s437_s20  }
   0xe   :  { %426 = dma.done.wait [#allocation3], 256  }
   0xf   :  { %427 = vsyncadd [#allocation3], 4294967040 }
  0x10   :  { %428 = dma.done.wait [#allocation6], 2176  }
  0x11   :  { %429 = vsyncadd [#allocation6], 4294965120 }
  0x12   :  { %430 = dma.done.wait [#allocation9], 2048  }
  0x13   :  { %431 = vsyncadd [#allocation9], 4294965248  ;;  %v440_v0 = vmov 0   ;;  %v94_v1 = vld [vmem:[%s525_s1] sm:$0xff]  ;;  %v441_v11 = vmov 1   ;;  %v131_v12 = vld [vmem:[#allocation2 + $0x8] sm:$0xff]  ;;  %v95_v26 = vlaneseq }
  0x14   :  { %301 = vset.pattern.permute.xlu0 %v440_v0  ;;  %vm97_vm0 = vcmp.lt.s32.totalorder %v94_v1, 6  ;;  %vm112_vm1 = vcmp.lt.s32.totalorder %v94_v1, 10  ;;  %150 = vmatpush.msra.mxu0 %v131_v12  ;;  %v130_v13 = vld [vmem:[#allocation2] sm:$0xff]  ;;  %v129_v14 = vld [vmem:[#allocation5] sm:$0xff]  ;;  %vm156_vm8 = vcmask 64512   ;;  %v200_v17 = vld [vmem:[#allocation7 + $0x70] sm:$0xff] }
  0x15   :  { %v98_v2 = vsel %vm97_vm0, %v94_v1, 5  ;;  %v113_v3 = vsel %vm112_vm1, %v94_v1, 9  ;;  %175 = vmatpush.msra.mxu1 %v129_v14  ;;  %v128_v15 = vld [vmem:[%s524_s0] sm:$0xff]  ;;  %v201_v16 = vld [vmem:[#allocation7 + $0x78] sm:$0xff]  ;;  %v198_v19 = vld [vmem:[#allocation7 + $0x60] sm:$0xff]  ;;  %v96_v30 = vand.u32 127, %v95_v26 }
  0x16   :  { %vm99_vm2 = vcmp.lt.s32.totalorder %v98_v2, 0  ;;  %vm114_vm3 = vcmp.lt.s32.totalorder %v113_v3, 0  ;;  %151 = vmatpush.msra.mxu0 %v130_v13  ;;  %290 = vmatmul.msk.f32.vlgmr.msra.gmra.mxu1 %vm156_vm8, %v128_v15  ;;  %v199_v18 = vld [vmem:[#allocation7 + $0x68] sm:$0xff]  ;;  %v197_v20 = vld [vmem:[#allocation7 + $0x58] sm:$0xff]  ;;  %v196_v21 = vld [vmem:[#allocation7 + $0x50] sm:$0xff]  ;;  %v442_v32 = vmov 0.0  }
  0x17   :  { %v100_v4 = vsel %vm99_vm2, %v98_v2, 0  ;;  %v115_v5 = vsel %vm114_vm3, %v113_v3, 0  ;;  %206 = vmatpush.msra.mxu2 %v201_v16  ;;  %v195_v22 = vld [vmem:[#allocation7 + $0x48] sm:$0xff]  ;;  %v194_v23 = vld [vmem:[#allocation7 + $0x40] sm:$0xff]  ;;  %v193_v24 = vld [vmem:[#allocation7 + $0x38] sm:$0xff]  ;;  %vm132_vm11 = vcmask 130048  }
  0x18   :  { %vm101_vm4 = vcmp.gt.s32.totalorder %v100_v4, 0  ;;  %vm116_vm5 = vcmp.gt.s32.totalorder %v115_v5, 0  ;;  %v192_v25 = vld [vmem:[#allocation7 + $0x30] sm:$0xff]  ;;  %v191_v28 = vld [vmem:[#allocation7 + $0x28] sm:$0xff]  ;;  %v190_v29 = vld [vmem:[#allocation7 + $0x20] sm:$0xff]  ;;  %s443_s13 = smov [#allocation10]  }
  0x19   :  { %v102_v6 = vsel %vm101_vm4, %v100_v4, 0  ;;  %v117_v7 = vsel %vm116_vm5, %v115_v5, 0  ;;  %207 = vmatpush.msra.mxu2 %v200_v17  ;;  %v189_v36 = vld [vmem:[#allocation7 + $0x18] sm:$0xff]  ;;  %v188_v37 = vld [vmem:[#allocation7 + $0x10] sm:$0xff]  ;;  %v187_v38 = vld [vmem:[#allocation7 + $0x8] sm:$0xff]  ;;  %s273_s14 = sshll.u32 %s443_s13, 4  ;;  %s274_s14 = int_to_ptr.vmem [resolvable:$true] %s273_s14 }
  0x1a   :  { %vm103_vm6 = vcmp.lt.s32.totalorder %v102_v6, 5  ;;  %vm118_vm7 = vcmp.lt.s32.totalorder %v117_v7, 9  ;;  %v186_v39 = vld [vmem:[#allocation7] sm:$0xff]  ;;  %v242_v40 = vld [vmem:[#allocation8 + $0x78] sm:$0xff]  ;;  %v241_v41 = vld [vmem:[#allocation8 + $0x70] sm:$0xff]  ;;  %s275_s17 = sshll.u32 %s533_s9, 4  ;;  %s276_s17 = int_to_ptr.hbm [resolvable:$true] %s275_s17 }
  0x1b   :  { %v104_v8 = vsel %vm103_vm6, %v102_v6, 5  ;;  %v119_v9 = vsel %vm118_vm7, %v117_v7, 9  ;;  %208 = vmatpush.msra.mxu2 %v199_v18  ;;  %247 = vmatpush.msra.mxu3 %v242_v40  ;;  %v240_v42 = vld [vmem:[#allocation8 + $0x68] sm:$0xff]  ;;  %v239_v43 = vld [vmem:[#allocation8 + $0x60] sm:$0xff]  ;;  %v238_v44 = vld [vmem:[#allocation8 + $0x58] sm:$0xff] }
  0x1c   :  { %106 = vperm.xlu0 %301, %v104_v8   ;;  %v120_v10 = vadd.s32 6, %v119_v9  ;;  %v237_v45 = vld [vmem:[#allocation8 + $0x50] sm:$0xff]  ;;  %v236_v46 = vld [vmem:[#allocation8 + $0x48] sm:$0xff]  ;;  %v235_v47 = vld [vmem:[#allocation8 + $0x40] sm:$0xff] }
  0x1d   :  { %209 = vmatpush.msra.mxu2 %v198_v19  ;;  %248 = vmatpush.msra.mxu3 %v241_v41  ;;  %v234_v48 = vld [vmem:[#allocation8 + $0x38] sm:$0xff]  ;;  %v233_v49 = vld [vmem:[#allocation8 + $0x30] sm:$0xff]  ;;  %v232_v50 = vld [vmem:[#allocation8 + $0x28] sm:$0xff] }
  0x1e   :  { %v231_v51 = vld [vmem:[#allocation8 + $0x20] sm:$0xff]  ;;  %v230_v52 = vld [vmem:[#allocation8 + $0x18] sm:$0xff]  ;;  %v303_v54 = vld [vmem:[%s528_s4] ss:$0 sm:$0xff] }
  0x1f   :  { %210 = vmatpush.msra.mxu2 %v197_v20  ;;  %249 = vmatpush.msra.mxu3 %v240_v42  ;;  %v229_v59 = vld [vmem:[#allocation8 + $0x10] sm:$0xff]  ;;  %v228_v60 = vld [vmem:[#allocation8 + $0x8] sm:$0xff]  ;;  %v227_v61 = vld [vmem:[#allocation8] sm:$0xff] }
  0x20   :  { %v304_v62 = vld [vmem:[%s530_s6] ss:$0 sm:$0xff] }
  0x21   :  { %211 = vmatpush.msra.mxu2 %v196_v21  ;;  %250 = vmatpush.msra.mxu3 %v239_v43  ;;  %v305_v2 = vld [vmem:[%s532_s8] ss:$0 sm:$0xff] }
  0x23   :  { %212 = vmatpush.msra.mxu2 %v195_v22  ;;  %251 = vmatpush.msra.mxu3 %v238_v44 }
  0x24   :  { %302 = vset.pattern.permute.xlu0 %v441_v11 }
  0x25   :  { %122 = vperm.xlu0 %302, %v120_v10   ;;  %213 = vmatpush.msra.mxu2 %v194_v23 }
  0x26   :  { %252 = vmatpush.msra.mxu3 %v237_v45 }
  0x27   :  { %214 = vmatpush.msra.mxu2 %v193_v24 }
  0x28   :  { %253 = vmatpush.msra.mxu3 %v236_v46 }
  0x29   :  { %215 = vmatpush.msra.mxu2 %v192_v25 }
  0x2a   :  { %254 = vmatpush.msra.mxu3 %v235_v47 }
  0x2b   :  { %216 = vmatpush.msra.mxu2 %v191_v28 }
  0x2c   :  { %255 = vmatpush.msra.mxu3 %v234_v48 }
  0x2d   :  { %217 = vmatpush.msra.mxu2 %v190_v29 }
  0x2e   :  { %256 = vmatpush.msra.mxu3 %v233_v49 }
  0x2f   :  { %218 = vmatpush.msra.mxu2 %v189_v36 }
  0x30   :  { %257 = vmatpush.msra.mxu3 %v232_v50 }
  0x31   :  { %219 = vmatpush.msra.mxu2 %v188_v37 }
  0x32   :  { %258 = vmatpush.msra.mxu3 %v231_v51 }
  0x33   :  { %220 = vmatpush.msra.mxu2 %v187_v38 }
  0x34   :  { %259 = vmatpush.msra.mxu3 %v230_v52 }
  0x35   :  { %221 = vmatpush.msra.mxu2 %v186_v39 }
  0x36   :  { %260 = vmatpush.msra.mxu3 %v229_v59 }
  0x38   :  { %261 = vmatpush.msra.mxu3 %v228_v60 }
  0x3a   :  { %262 = vmatpush.msra.mxu3 %v227_v61 }
  0x8e   :  { %v107_v27 = vpop.permute.xlu0 %106 }
  0x8f   :  { %vm108_vm9 = vcmp.eq.s32.totalorder %v96_v30, %v107_v27 }
  0x90   :  { %v287_v33 = vsel %vm108_vm9, 1.0, %v442_v32 }
  0x93   :  { %v177_v53 = vpop.f32.mrf.mxu1 }
  0x97   :  { %v123_v31 = vpop.permute.xlu0 %122 }
  0x98   :  { %vm124_vm10 = vcmp.eq.s32.totalorder %v96_v30, %v123_v31 }
  0x99   :  { %v288_v34 = vsel %vm124_vm10, 1.0, %v442_v32 }
  0x9a   :  { %v127_v35 = vadd.f32 %v288_v34, %v287_v33 }
  0x9c   :  { %289 = vmatmul.msk.f32.vlgmr.msra.gmra.mxu0 %vm132_vm11, %v127_v35 }
 0x119   :  { %v153_v55 = vpop.f32.mrf.mxu0 }
 0x11a   :  { %v178_v56 = vadd.f32 %v177_v53, %v153_v55 }
 0x11c   :  { %v184_v57 = vadd.f32 %v303_v54, %v178_v56 }
 0x11e   :  { %v185_v58 = vmax.f32 %v184_v57, 0.0 }
 0x120   :  { %222 = vmatmul.f32.vlgmr.msra.gmra.mxu2 %v185_v58 }
 0x1a3   :  { %v223_v63 = vpop.f32.mrf.mxu2 }
 0x1a4   :  { %v224_v0 = vadd.f32 %v304_v62, %v223_v63 }
 0x1a6   :  { %v226_v1 = vmax.f32 %v224_v0, 0.0 }
 0x1a8   :  { %263 = vmatmul.f32.vlgmr.msra.gmra.mxu3 %v226_v1 }
 0x22b   :  { %v264_v3 = vpop.f32.mrf.mxu3 }
 0x22c   :  { %v265_v4 = vadd.f32 %v305_v2, %v264_v3 }
 0x22e   :  { %267 = vst [vmem:[#allocation10] sm:$0xff] %v265_v4 }
 0x22f   :  { %278 = dma.vmem_to_hbm [thread:$0]  %s274_s14, 128, %s276_s17, [#allocation4]  }
 0x230   :  { %432 = dma.done.wait [#allocation4], 128  }
 0x231   :  { %433 = vsyncadd [#allocation4], 4294967168 }
 0x232   :  { %283 = vsyncpa [#allocation3], 1 }
 0x233   :  { %284 = vsyncpa [#allocation6], 1 }
 0x234   :  { %285 = vsyncpa [#allocation9], 1 }
 0x235   :  { %286 = vsyncpa [#allocation4], 1 }

</bundles_post_ra>
